<compile_context>
chip_gen: v5e
topology: v5e:2x2
jax: 0.10.0
libtpu: 0.0.40
codegen_flags: <defaults>
</compile_context>

<pallas_src>
import functools
import math

import jax
import jax.numpy as jnp
import numpy as np
from jax import lax
from jax.experimental import pallas as pl
from jax.experimental.pallas import tpu as pltpu


_FUSED_MAX_PLANES = 64            # bound for the static copy loops in the fused path
_FUSED_WORK_THRESHOLD = 1 << 22   # H*Ho*Wo below this -> per-plane matmuls are bubble-bound


# ----------------------------------------------------------------------------
# Separable interpolation matrices with PyTorch F.interpolate semantics.
# ----------------------------------------------------------------------------
def _interp_matrix(in_size, out_size, scale, mode, align_corners):
    """(out_size, in_size) interpolation matrix (float64 numpy)."""
    out_idx = np.arange(out_size, dtype=np.float64)
    W = np.zeros((out_size, in_size), dtype=np.float64)
    # PyTorch uses the provided scale_factor directly (recompute_scale_factor=None).
    inv_scale = 1.0 / float(scale)

    if mode == "nearest":
        src = np.floor(out_idx * inv_scale).astype(np.int64)
        src = np.clip(src, 0, in_size - 1)
        W[np.arange(out_size), src] = 1.0
    elif mode == "bilinear":
        if align_corners:
            s = (in_size - 1) / (out_size - 1) if out_size > 1 else 0.0
            src = s * out_idx
        else:
            src = inv_scale * (out_idx + 0.5) - 0.5
            src = np.maximum(src, 0.0)          # PyTorch clamps negative source coords
        lo = np.clip(np.floor(src).astype(np.int64), 0, in_size - 1)
        hi = np.minimum(lo + 1, in_size - 1)
        frac = src - lo
        np.add.at(W, (np.arange(out_size), lo), 1.0 - frac)
        np.add.at(W, (np.arange(out_size), hi), frac)
    else:
        # TODO(synk): 'bicubic' / 'area' / 'trilinear' modes not implemented.
        raise NotImplementedError(f"mode={mode}")
    return W


# ----------------------------------------------------------------------------
# VMEM planning (generation-aware).
# ----------------------------------------------------------------------------
@functools.lru_cache(maxsize=1)
def _vmem_budget_bytes():
    try:
        cap = int(pltpu.get_tpu_info().vmem_capacity_bytes)
    except Exception:
        cap = 64 * 1024 * 1024            # conservative: v7x per-TensorCore VMEM
    limit = int(cap * 0.80)               # handed to Mosaic as vmem_limit_bytes
    budget = int(limit * 0.45)            # soft per-step working-set target
    return budget, limit


def _plan(N, H, W, Ho, Wo, io_isize, c_isize):
    """Pick planes-per-step P, number of grid steps, and the stage-2 regime."""
    budget, limit = _vmem_budget_bytes()
    use_fused = (H * Ho * Wo) <= _FUSED_WORK_THRESHOLD

    per_plane = (2 * H * W * io_isize        # double-buffered input block
                 + 2 * Ho * Wo * io_isize    # double-buffered output block
                 + H * Wo * c_isize)         # stage-1 scratch
    if use_fused:
        per_plane += H * Wo * c_isize + Ho * Wo * io_isize   # relayout scratches
    fixed = 2 * (Ho * H + W * Wo) * c_isize  # weight blocks (charged double-buffered)

    # Sublane granularity of the I/O dtype (8 for f32, 16 for bf16, 32 for int8).
    g = 8 * max(1, 4 // io_isize)
    a = math.lcm(g // math.gcd(g, H), g // math.gcd(g, Ho))

    p = max(1, (budget - fixed) // per_plane)
    p = min(p, -(-N // min(N, 4)))           # keep >= min(N, 4) grid steps
    if use_fused:
        p = min(p, _FUSED_MAX_PLANES)
    if p < N:                                # multi-step grid needs 8-aligned block rows
        p = max(a, (p // a) * a)
    if p >= N:
        p = N                                # single step: blocks span the full arrays
    if fixed + p * per_plane > limit:        # never exceed the hard VMEM limit
        p = a if a < N else N
        if fixed + p * per_plane > limit:
            return None, None, use_fused     # plane too large for the un-tiled kernel
    num_steps = -(-N // p)
    return p, num_steps, use_fused


# ----------------------------------------------------------------------------
# Pallas kernels.
# ----------------------------------------------------------------------------
def _resize_kernel_loop(wy_ref, wxt_ref, x_ref, o_ref, s1_ref):
    """Large planes: one big stage-1 matmul, fori_loop of per-plane stage-2 matmuls."""
    Ho, H = wy_ref.shape
    P = x_ref.shape[0] // H
    cdt = wxt_ref.dtype

    # Stage 1 (W-contraction): all P planes in ONE MXU matmul (M = P*H rows).
    s1_ref[...] = jnp.dot(
        x_ref[...].astype(cdt), wxt_ref[...],
        preferred_element_type=jnp.float32).astype(cdt)

    # Stage 2 (H-contraction): visible loop over VMEM-scratch ref slices.
    def body(p, carry):
        rs = p * H
        ro = p * Ho
        if H % 8 == 0:
            rs = pl.multiple_of(rs, 8)
        if Ho % 8 == 0:
            ro = pl.multiple_of(ro, 8)
        out = jnp.dot(wy_ref[...], s1_ref[pl.ds(rs, H), :],
                      preferred_element_type=jnp.float32)
        o_ref[pl.ds(ro, Ho), :] = out.astype(o_ref.dtype)
        return carry

    lax.fori_loop(0, P, body, 0)


def _resize_kernel_fused(wy_ref, wxt_ref, x_ref, o_ref, s1_ref, t_ref, o2_ref):
    """Small planes: both stages as single big MXU matmuls; stage-2 is lane-dense."""
    Ho, H = wy_ref.shape
    Wo = wxt_ref.shape[1]
    P = x_ref.shape[0] // H
    cdt = wxt_ref.dtype

    # Stage 1 (W-contraction): ONE MXU matmul over all P planes (M = P*H rows).
    s1_ref[...] = jnp.dot(
        x_ref[...].astype(cdt), wxt_ref[...],
        preferred_element_type=jnp.float32).astype(cdt)

    # Relayout (P, H, Wo) -> (H, P*Wo) through VMEM using static ref slices only.
    for p in range(P):
        t_ref[:, p * Wo:(p + 1) * Wo] = s1_ref[p * H:(p + 1) * H, :]

    # Stage 2 (H-contraction): ONE lane-dense MXU matmul, N = P*Wo columns.
    o2_ref[...] = jnp.dot(wy_ref[...], t_ref[...],
                          preferred_element_type=jnp.float32).astype(o_ref.dtype)

    # Scatter per-plane column blocks back to the natural (plane*Ho, Wo) layout.
    for p in range(P):
        o_ref[p * Ho:(p + 1) * Ho, :] = o2_ref[:, p * Wo:(p + 1) * Wo]


# ----------------------------------------------------------------------------
# Wrapper.
# ----------------------------------------------------------------------------
@functools.partial(jax.jit,
                   static_argnames=("scale_factor", "mode", "align_corners", "precision"))
def resize(x, *, scale_factor, mode, align_corners=False, precision="default"):
    B, C, H, W = x.shape
    Ho = int(math.floor(H * scale_factor))
    Wo = int(math.floor(W * scale_factor))

    # MXU compute dtype.  Default: bf16 inputs -> bf16 operands / f32 accumulate;
    # f32 inputs stay f32.  "fast" demotes f32 too; "highest" forces f32 operands.
    if precision == "highest":
        cdtype = jnp.float32
    elif precision == "fast":
        cdtype = jnp.bfloat16
    elif np.dtype(x.dtype) == np.dtype(jnp.bfloat16):
        cdtype = jnp.bfloat16
    else:
        cdtype = jnp.float32

    wy = jnp.asarray(_interp_matrix(H, Ho, scale_factor, mode, align_corners),
                     dtype=cdtype)                                    # (Ho, H)
    wxt = jnp.asarray(_interp_matrix(W, Wo, scale_factor, mode, align_corners).T,
                      dtype=cdtype)                                   # (W, Wo)

    N = B * C
    io_isize = np.dtype(x.dtype).itemsize
    c_isize = np.dtype(cdtype).itemsize
    P, num_steps, use_fused = _plan(N, H, W, Ho, Wo, io_isize, c_isize)

    if P is None:
        # TODO(synk): add an Ho/K-tiled kernel for planes whose working set
        # exceeds VMEM; until then fall back to plain XLA to preserve semantics.
        t = jnp.einsum("bchw,wq->bchq", x.astype(cdtype), wxt,
                       preferred_element_type=jnp.float32)
        out = jnp.einsum("oh,bchq->bcoq", wy.astype(jnp.float32), t,
                         preferred_element_type=jnp.float32)
        return out.astype(x.dtype)

    Np = num_steps * P
    x2 = x.reshape(N * H, W)                  # free reshape: plane n owns rows [n*H,(n+1)*H)
    if Np != N:
        x2 = jnp.pad(x2, ((0, (Np - N) * H), (0, 0)))

    _, vmem_limit = _vmem_budget_bytes()
    flops = 2 * Np * (H * W * Wo + Ho * H * Wo)
    bytes_accessed = (Np * H * W * io_isize + Np * Ho * Wo * io_isize
                      + (Ho * H + W * Wo) * c_isize)

    if use_fused:
        kernel = _resize_kernel_fused
        scratch = [pltpu.VMEM((P * H, Wo), cdtype),     # stage-1 result
                   pltpu.VMEM((H, P * Wo), cdtype),     # relayouted stage-2 rhs
                   pltpu.VMEM((Ho, P * Wo), x.dtype)]   # lane-dense stage-2 result
    else:
        kernel = _resize_kernel_loop
        scratch = [pltpu.VMEM((P * H, Wo), cdtype)]     # stage-1 result

    out2 = pl.pallas_call(
        kernel,
        out_shape=jax.ShapeDtypeStruct((Np * Ho, Wo), x.dtype),
        grid_spec=pltpu.PrefetchScalarGridSpec(
            num_scalar_prefetch=0,
            grid=(num_steps,),
            in_specs=[
                pl.BlockSpec((Ho, H), lambda n: (0, 0)),      # Wy   (VMEM-resident)
                pl.BlockSpec((W, Wo), lambda n: (0, 0)),      # Wx^T (VMEM-resident)
                pl.BlockSpec((P * H, W), lambda n: (n, 0)),   # P planes per step
            ],
            out_specs=pl.BlockSpec((P * Ho, Wo), lambda n: (n, 0)),
            scratch_shapes=scratch,
        ),
        compiler_params=pltpu.CompilerParams(
            dimension_semantics=("parallel",),   # planes independent -> both TCs on v7x
            vmem_limit_bytes=vmem_limit,
        ),
        cost_estimate=pl.CostEstimate(
            flops=flops, transcendentals=0, bytes_accessed=bytes_accessed),
    )(wy, wxt, x2)

    return out2[:N * Ho].reshape(B, C, Ho, Wo)


# ----------------------------------------------------------------------------
# Module-style wrapper mirroring boardom.models.resize.Resize
# ----------------------------------------------------------------------------
class Resize:
    def __init__(self, scale_factor, mode, align_corners=False, precision="default"):
        self.scale_factor = scale_factor
        self.mode = mode
        self.align_corners = align_corners
        self.precision = precision

    def __call__(self, t_in):
        return resize(
            t_in,
            scale_factor=self.scale_factor,
            mode=self.mode,
            align_corners=self.align_corners,
            precision=self.precision,
        )

    def extra_repr(self):
        return f"Factor: {self.scale_factor}, Mode: {self.mode}"


# ----------------------------------------------------------------------------
# Self-test.
# ----------------------------------------------------------------------------
def _np_reference(x_np, scale, mode, align_corners):
    _, _, H, W = x_np.shape
    Ho, Wo = int(math.floor(H * scale)), int(math.floor(W * scale))
    wy = _interp_matrix(H, Ho, scale, mode, align_corners)
    wx = _interp_matrix(W, Wo, scale, mode, align_corners)
    return np.einsum("oh,bchw,pw->bcop", wy, x_np.astype(np.float64), wx, optimize=True)


if __name__ == "__main__":
    key = jax.random.PRNGKey(0)
    k1, k2, k3, k4 = jax.random.split(key, 4)

    # 1) Small bilinear upsample (fused lane-dense stage-2 path), f32.
    x = jax.random.normal(k1, (2, 4, 16, 16), dtype=jnp.float32)
    out = jax.block_until_ready(Resize(2, "bilinear", align_corners=False)(x))
    assert out.shape == (2, 4, 32, 32) and out.dtype == x.dtype
    np.testing.assert_allclose(np.asarray(out),
                               _np_reference(np.asarray(x), 2, "bilinear", False),
                               rtol=1e-5, atol=1e-5)

    # 2) Nearest upsample (one-hot weights -> exact replicate).
    out_nn = jax.block_until_ready(Resize(2, "nearest")(x))
    np.testing.assert_allclose(np.asarray(out_nn),
                               _np_reference(np.asarray(x), 2, "nearest", False),
                               rtol=1e-5, atol=1e-5)

    # 3) Bilinear downsample with align_corners=True.
    out_dn = jax.block_until_ready(Resize(0.5, "bilinear", align_corners=True)(x))
    np.testing.assert_allclose(np.asarray(out_dn),
                               _np_reference(np.asarray(x), 0.5, "bilinear", True),
                               rtol=1e-5, atol=1e-5)

    # 4) Multi-step grid with plane padding (N=42 -> P=11, 4 steps, 2 padded planes).
    x_pad = jax.random.normal(k2, (2, 21, 16, 16), dtype=jnp.float32)
    out_pad = jax.block_until_ready(Resize(2, "bilinear")(x_pad))
    np.testing.assert_allclose(np.asarray(out_pad),
                               _np_reference(np.asarray(x_pad), 2, "bilinear", False),
                               rtol=1e-5, atol=1e-5)

    # 5) bf16 input -> bf16 MXU operands with f32 accumulation.
    x_bf = jax.random.normal(k3, (2, 4, 16, 16), dtype=jnp.bfloat16)
    out_bf = jax.block_until_ready(Resize(2, "bilinear")(x_bf))
    assert out_bf.dtype == jnp.bfloat16
    np.testing.assert_allclose(np.asarray(out_bf).astype(np.float32),
                               _np_reference(np.asarray(x_bf).astype(np.float32),
                                             2, "bilinear", False),
                               rtol=3e-2, atol=3e-2)

    # 6) Larger planes -> fori_loop stage-2 path (P=2, 4 grid steps).
    x_big = jax.random.normal(k4, (2, 4, 128, 128), dtype=jnp.float32)
    out_big = jax.block_until_ready(Resize(2, "bilinear")(x_big))
    np.testing.assert_allclose(np.asarray(out_big),
                               _np_reference(np.asarray(x_big), 2, "bilinear", False),
                               rtol=1e-5, atol=1e-5)

    print("KERNEL_OK")
</pallas_src>

<mosaic_0001>
module attributes {stable_mosaic.version = 11 : i64} {
  func.func @_resize_kernel_fused(%arg0: i32, %arg1: memref<32x16xf32, #tpu.memory_space<vmem>>, %arg2: memref<16x32xf32, #tpu.memory_space<vmem>>, %arg3: memref<32x16xf32, #tpu.memory_space<vmem>>, %arg4: memref<64x32xf32, #tpu.memory_space<vmem>>, %arg5: memref<32x32xf32, #tpu.memory_space<vmem>>, %arg6: memref<16x64xf32, #tpu.memory_space<vmem>>, %arg7: memref<32x64xf32, #tpu.memory_space<vmem>>) attributes {dimension_semantics = [#tpu.dimension_semantics<parallel>], iteration_bounds = array<i64: 4>, scalar_prefetch = 0 : i64, scratch_operands = 3 : i64, tpu.core_type = #tpu.core_type<tc>, window_params = [{pipeline_mode = #tpu.pipeline_mode<synchronous>, transform_indices = @transform_0, window_bounds = array<i64: 32, 16>}, {pipeline_mode = #tpu.pipeline_mode<synchronous>, transform_indices = @transform_1, window_bounds = array<i64: 16, 32>}, {transform_indices = @transform_2, window_bounds = array<i64: 32, 16>}, {transform_indices = @transform_3, window_bounds = array<i64: 64, 32>}]} {
    %c0 = arith.constant 0 : index
    %c0_0 = arith.constant 0 : index
    %0 = vector.load %arg3[%c0, %c0_0] : memref<32x16xf32, #tpu.memory_space<vmem>>, vector<32x16xf32>
    %c0_1 = arith.constant 0 : index
    %c0_2 = arith.constant 0 : index
    %1 = vector.load %arg2[%c0_1, %c0_2] : memref<16x32xf32, #tpu.memory_space<vmem>>, vector<16x32xf32>
    %cst = arith.constant dense<0.000000e+00> : vector<32x32xf32>
    %2 = tpu.matmul %0, %1, %cst {dimension_numbers = #tpu.dot_dimension_numbers<[1], [0], [0], [1], [0, 0, 1, 1], [], []>} : vector<32x16xf32>, vector<16x32xf32>, vector<32x32xf32> -> vector<32x32xf32>
    %c0_3 = arith.constant 0 : index
    %c0_4 = arith.constant 0 : index
    %3 = vector.load %arg5[%c0_3, %c0_4] : memref<32x32xf32, #tpu.memory_space<vmem>>, vector<32x32xf32>
    tpu.vector_store %arg5[%c0_3, %c0_4], %2 {strides = array<i32>} : memref<32x32xf32, #tpu.memory_space<vmem>>, vector<32x32xf32>,
    %c0_5 = arith.constant 0 : index
    %c0_6 = arith.constant 0 : index
    %4 = vector.load %arg5[%c0_5, %c0_6] : memref<32x32xf32, #tpu.memory_space<vmem>>, vector<16x32xf32>
    %c0_7 = arith.constant 0 : index
    %c0_8 = arith.constant 0 : index
    %5 = vector.load %arg6[%c0_7, %c0_8] : memref<16x64xf32, #tpu.memory_space<vmem>>, vector<16x32xf32>
    tpu.vector_store %arg6[%c0_7, %c0_8], %4 {strides = array<i32>} : memref<16x64xf32, #tpu.memory_space<vmem>>, vector<16x32xf32>,
    %c16 = arith.constant 16 : index
    %c0_9 = arith.constant 0 : index
    %6 = vector.load %arg5[%c16, %c0_9] : memref<32x32xf32, #tpu.memory_space<vmem>>, vector<16x32xf32>
    %c0_10 = arith.constant 0 : index
    %c32 = arith.constant 32 : index
    %7 = vector.load %arg6[%c0_10, %c32] : memref<16x64xf32, #tpu.memory_space<vmem>>, vector<16x32xf32>
    tpu.vector_store %arg6[%c0_10, %c32], %6 {strides = array<i32>} : memref<16x64xf32, #tpu.memory_space<vmem>>, vector<16x32xf32>,
    %c0_11 = arith.constant 0 : index
    %c0_12 = arith.constant 0 : index
    %8 = vector.load %arg1[%c0_11, %c0_12] : memref<32x16xf32, #tpu.memory_space<vmem>>, vector<32x16xf32>
    %c0_13 = arith.constant 0 : index
    %c0_14 = arith.constant 0 : index
    %9 = vector.load %arg6[%c0_13, %c0_14] : memref<16x64xf32, #tpu.memory_space<vmem>>, vector<16x64xf32>
    %cst_15 = arith.constant dense<0.000000e+00> : vector<32x64xf32>
    %10 = tpu.matmul %8, %9, %cst_15 {dimension_numbers = #tpu.dot_dimension_numbers<[1], [0], [0], [1], [0, 0, 1, 1], [], []>} : vector<32x16xf32>, vector<16x64xf32>, vector<32x64xf32> -> vector<32x64xf32>
    %c0_16 = arith.constant 0 : index
    %c0_17 = arith.constant 0 : index
    %11 = vector.load %arg7[%c0_16, %c0_17] : memref<32x64xf32, #tpu.memory_space<vmem>>, vector<32x64xf32>
    tpu.vector_store %arg7[%c0_16, %c0_17], %10 {strides = array<i32>} : memref<32x64xf32, #tpu.memory_space<vmem>>, vector<32x64xf32>,
    %c0_18 = arith.constant 0 : index
    %c0_19 = arith.constant 0 : index
    %12 = vector.load %arg7[%c0_18, %c0_19] : memref<32x64xf32, #tpu.memory_space<vmem>>, vector<32x32xf32>
    %c0_20 = arith.constant 0 : index
    %c0_21 = arith.constant 0 : index
    %13 = vector.load %arg4[%c0_20, %c0_21] : memref<64x32xf32, #tpu.memory_space<vmem>>, vector<32x32xf32>
    tpu.vector_store %arg4[%c0_20, %c0_21], %12 {strides = array<i32>} : memref<64x32xf32, #tpu.memory_space<vmem>>, vector<32x32xf32>,
    %c0_22 = arith.constant 0 : index
    %c32_23 = arith.constant 32 : index
    %14 = vector.load %arg7[%c0_22, %c32_23] : memref<32x64xf32, #tpu.memory_space<vmem>>, vector<32x32xf32>
    %c32_24 = arith.constant 32 : index
    %c0_25 = arith.constant 0 : index
    %15 = vector.load %arg4[%c32_24, %c0_25] : memref<64x32xf32, #tpu.memory_space<vmem>>, vector<32x32xf32>
    tpu.vector_store %arg4[%c32_24, %c0_25], %14 {strides = array<i32>} : memref<64x32xf32, #tpu.memory_space<vmem>>, vector<32x32xf32>,
    return
  }
  func.func @transform_0(%arg0: i32) -> (i32, i32) {
    %c0_i32 = arith.constant 0 : i32
    %c0_i32_0 = arith.constant 0 : i32
    %c0_i32_1 = arith.constant 0 : i32
    return %c0_i32, %c0_i32_0 : i32, i32
  }
  func.func @transform_1(%arg0: i32) -> (i32, i32) {
    %c0_i32 = arith.constant 0 : i32
    %c0_i32_0 = arith.constant 0 : i32
    %c0_i32_1 = arith.constant 0 : i32
    return %c0_i32, %c0_i32_0 : i32, i32
  }
  func.func @transform_2(%arg0: i32) -> (i32, i32) {
    %c0_i32 = arith.constant 0 : i32
    %c0_i32_0 = arith.constant 0 : i32
    return %arg0, %c0_i32 : i32, i32
  }
  func.func @transform_3(%arg0: i32) -> (i32, i32) {
    %c0_i32 = arith.constant 0 : i32
    %c0_i32_0 = arith.constant 0 : i32
    return %arg0, %c0_i32 : i32, i32
  }
}

</mosaic_0001>

<bundles_post_ra>
// kernel: resize.1
= control target key start
LH: loop header
LB: loop body
LE: loop exit
PB: predicated region body
PF: predicated region fallthrough
CT: control target
= control target key end

     0   :  { %8 = vsyncpa [#allocation6], 0  ;;  %s961_s0 = inlined_call_operand.hbm [shape: f32[32,16], index: 0, kind: input, shape index: {}]   ;;  %s962_s1 = inlined_call_operand.hbm [shape: f32[16,32], index: 1, kind: input, shape index: {}]   ;;  %s963_s2 = inlined_call_operand.hbm [shape: f32[128,16], index: 2, kind: input, shape index: {}]   ;;  %s964_s3 = inlined_call_operand.hbm [shape: f32[256,32], index: 3, kind: output, shape index: {}]  }
   0x1   :  { %9 = vsyncpa [#allocation9], 0 }
   0x2   :  { %10 = vsyncpa [#allocation7], 0 }
   0x3   :  { %12 = vsyncpa [#allocation7 + $0x1], 0  ;;  %s785_s12 = smov 0   ;;  %s787_s13 = smov 0  }
   0x4   :  { %s789_s14 = smov 0   ;;  %s791_s15 = smov 0  }
   0x5 LB: > { %s806_s16 = sadd.s32 4294967295, %s755_s15   ;;  %s486_s17 = sadd.s32 4294967294, %s755_s15   ;;  %s755_s15 = sphi %s791_s15, %s973_s15   ;;  %s751_s14 = sphi %s789_s14, %s972_s14   ;;  %s747_s13 = sphi %s787_s13, %s971_s13   ;;  %s743_s12 = sphi %s785_s12, %s970_s12  }
   0x6   : > { %p80_p0 = scmp.ne.s32.totalorder %s747_s13, %s743_s12  ;;  %p81_p1 = scmp.eq.s32.totalorder %s806_s16, 0 }
   0x7   : > { %p104_p2 = scmp.eq.s32.totalorder %s806_s16, 3  ;;  %p110_p3 = scmp.eq.s32.totalorder %s486_s17, 3 }
   0x8   : > { %p815_p4 = por %p81_p1, %p80_p0  ;;  %p487_p5 = scmp.ge.s32.totalorder %s755_s15, 1 }
   0x9   : > { %p820_p6 = por %p110_p3, %p80_p0  ;;  %p117_p7 = scmp.lt.s32.totalorder %s755_s15, 5 }
   0xa   : > { %s128_s22 = sshll.u32 %s961_s0, 4  ;;  %s757_s24 = smov [#allocation5]   ;;  %s129_s22 = int_to_ptr.hbm [resolvable:$true] %s128_s22 }
   0xb   : > { %p828_p8 = pnand %p487_p5, %p117_p7  ;;  %s130_s25 = sshll.u32 %s757_s24, 4  ;;  %s131_s25 = int_to_ptr.vmem [resolvable:$true] %s130_s25 }
   0xc   : > { %s142_s28 = sshll.u32 %s962_s1, 4  ;;  %s758_s29 = smov 128   ;;  %s143_s28 = int_to_ptr.hbm [resolvable:$true] %s142_s28 }
   0xd   : > { %p530_p9 = pneg %p828_p8  ;;  %s759_s30 = smov 8  }
   0xe   : > { %s760_s4 = smov [#allocation8]   ;;  %s846_s6 = sadd.s32 1, %s755_s15  }
   0xf   : > { %p531_p10 = pnand %p530_p9, %p81_p1  ;;  %s144_s5 = sshll.u32 %s760_s4, 4  ;;  %s145_s5 = int_to_ptr.vmem [resolvable:$true] %s144_s5 }
  0x10   : > { %s67_s7 = sadd.s32 1, %s751_s14  ;;  %s64_s8 = ssub.s32 %s755_s15, %s846_s6 }
  0x11   : > { %533 = dma.hbm_to_vmem [thread:$0]  (!%p531_p10), %s129_s22, 512, %s131_s25, [#allocation6], %s758_s29, %s758_s29, %s759_s30  }
  0x12   : > { %536 = dma.hbm_to_vmem [thread:$0]  (!%p531_p10), %s143_s28, 256, %s145_s5, [#allocation9], %s758_s29, %s758_s29, %s759_s30  }
  0x13   : > { %p74_p11 = scmp.ne.s32.totalorder %s751_s14, %s747_s13  ;;  %p65_p12 = scmp.eq.s32.totalorder %s64_s8, 0 }
  0x14   : > { %p75_p13 = scmp.eq.s32.totalorder %s755_s15, 0  ;;  %p547_p5 = scmp.lt.s32.totalorder %s755_s15, 4 }
  0x15   : > { %p856_p0 = por %p104_p2, %p74_p11  ;;  %s158_s11 = sand.u32 1, %s755_s15  }
  0x16   : > { %s861_s10 = scalar_select %p65_p12, %s751_s14, %s67_s7  }
  0x17   : > { %p76_p3 = por %p75_p13, %p74_p11  ;;  %s160_s17 = sand.u32 1, %s751_s14  }
  0x18   : > { %s491_s20 = sshll.u32 %s160_s17, 5  ;;  %s512_s21 = sshll.u32 %s755_s15, 5 }
  0x19   : > { %s167_s25 = scalar_lea.hbm %s963_s2, %s512_s21  ;;  %s162_s27 = scalar_lea.vmem [#allocation10], %s491_s20 }
  0x1a   : > { %s168_s26 = sshll.u32 %s167_s25, 4  ;;  %s170_s28 = sshll.u32 %s162_s27, 4  ;;  %s169_s26 = int_to_ptr.hbm [resolvable:$true] %s168_s26  ;;  %s171_s28 = int_to_ptr.vmem [resolvable:$true] %s170_s28 }
  0x1b   : > { %p870_p2 = pnand %p547_p5, %p76_p3  ;;  %s159_s5 = scalar_lea.sflag [#allocation6], %s158_s11 }
  0x1c   : > { %s651_s7 = sshra.s32 %s169_s26, 4  ;;  %s658_s20 = scalar_lea.hbm %s963_s2, 128  ;;  %s652_s7 = int_to_ptr.hbm [resolvable:$true] %s651_s7 }
  0x1d   : > { %s653_s8 = scalar_lea.hbm %s652_s7, 32  ;;  %p655_p9 = pneg %p870_p2 }
  0x1e   : > { %p654_p7 = scmp.ne.s32.totalorder %s652_s7, %s653_s8  ;;  %p659_p12 = scmp.lt.s32.totalorder %s652_s7, %s963_s2 }
  0x1f   : > { %p660_p13 = scmp.lt.s32.totalorder %s658_s20, %s653_s8 }
  0x20   : > { %p656_p10 = pnand %p655_p9, %p654_p7 }
  0x21   : > { %p661_p3 = por %p660_p13, %p659_p12 }
  0x22   : > { %p657_p11 = pneg %p656_p10 }
  0x24   : > { %p662_p5 = pnand %p661_p3, %p657_p11 }
  0x26   : > { %665 = shalt.err (!%p662_p5)
}
  0x27   : > { %540 = dma.hbm_to_vmem [thread:$0]  (!%p870_p2), %s169_s26, 512, %s171_s28, %s159_s5, %s758_s29, %s758_s29, %s759_s30  }
  0x28   : > { %182 = sbr.rel (%p828_p8) target bundleno = 597 (0x255), region = 32 }
  0x2d   : > { %726 = dma.done.wait (%p81_p1), [#allocation6], 512  }
  0x2e   : > { %728 = vsyncadd (%p81_p1), [#allocation6], 4294966784 }
  0x2f   : > { %730 = dma.done.wait (%p81_p1), [#allocation9], 256  }
  0x30   : > { %732 = vsyncadd (%p81_p1), [#allocation9], 4294967040  ;;  %s194_s11 = sand.u32 1, %s806_s16   ;;  %s899_s29 = sand.u32 1, %s747_s13  }
  0x31   : > { %s497_s23 = sshll.u32 %s899_s29, 5  ;;  %s195_s30 = scalar_lea.sflag [#allocation6], %s194_s11 }
  0x32   : > { %s198_s25 = scalar_lea.vmem [#allocation10], %s497_s23 }
  0x33   : > { %734 = dma.done.wait (%p815_p4), %s195_s30, 512  }
  0x34   : > { %736 = vsyncadd (%p815_p4), %s195_s30, 4294966784  ;;  %v229_v0 = vld [vmem:[#allocation8 + $0x8] sm:$0xff]  ;;  %v228_v1 = vld [vmem:[#allocation8] sm:$0xff]  ;;  %vm230_vm0 = vcmask 130048   ;;  %vm272_vm1 = vcmask 261120   ;;  %s761_s18 = smov 32  }
  0x35   : > { %514 = vmatpush.msra.mxu2 %v229_v0  ;;  %v226_v2 = vld [vmem:[%s198_s25 + $0x10] sm:$0xff]  ;;  %257 = vmatpush.msra.mxu0 %v229_v0  ;;  %v224_v3 = vld [vmem:[%s198_s25] sm:$0xff]  ;;  %v227_v4 = vld [vmem:[%s198_s25 + $0x18] sm:$0xff]  ;;  %vm291_vm2 = vcmask 523520   ;;  %vm341_vm3 = vcmask 523264   ;;  %s498_s26 = sshll.u32 %s899_s29, 6 }
  0x36   : > { %v225_v5 = vld [vmem:[%s198_s25 + $0x8] sm:$0xff]  ;;  %v294_v17 = vld [vmem:[#allocation5] sm:$0xff]  ;;  %v296_v18 = vld [vmem:[#allocation5 + $0x10] sm:$0xff]  ;;  %s762_s27 = smov 96   ;;  %s221_s28 = scalar_lea.vmem [#allocation11], %s498_s26 }
  0x37   : > { %515 = vmatpush.msra.mxu2 %v228_v1  ;;  %258 = vmatpush.msra.mxu0 %v228_v1  ;;  %v295_v20 = vld [vmem:[#allocation5 + $0x8] sm:$0xff]  ;;  %v297_v21 = vld [vmem:[#allocation5 + $0x18] sm:$0xff]  ;;  %s513_s4 = sshll.u32 %s806_s16, 6  ;;  %s391_s17 = sshll.u32 %s221_s28, 4  ;;  %s392_s17 = int_to_ptr.vmem [resolvable:$true] %s391_s17 }
  0x38   : > { %501 = vmatmul.msk.f32.vlgmr.msra.gmra.mxu2 %vm230_vm0, %v226_v2  ;;  %499 = vmatmul.msk.f32.vlgmr.msra.gmra.mxu0 %vm230_vm0, %v224_v3  ;;  %s390_s8 = scalar_lea.hbm %s964_s3, %s513_s4  ;;  %s379_s20 = scalar_lea.sflag [#allocation7], %s899_s29 }
  0x39   : > { %s393_s21 = sshll.u32 %s390_s8, 4  ;;  %s701_s23 = scalar_lea.hbm %s964_s3, 256  ;;  %s394_s21 = int_to_ptr.hbm [resolvable:$true] %s393_s21 }
  0x3a   : > { %s695_s22 = sshra.s32 %s394_s21, 4  ;;  %s696_s22 = int_to_ptr.hbm [resolvable:$true] %s695_s22 }
  0x3b   : > { %s697_s24 = scalar_lea.hbm %s696_s22, 64  ;;  %p702_p2 = scmp.lt.s32.totalorder %s696_s22, %s964_s3 }
  0x3c   : > { %p698_p1 = scmp.ne.s32.totalorder %s696_s22, %s697_s24  ;;  %p703_p7 = scmp.lt.s32.totalorder %s701_s23, %s697_s24 }
  0x3e   : > { %p699_p4 = pnand %p698_p1, %p856_p0  ;;  %p704_p9 = por %p703_p7, %p702_p2 }
  0x40   : > { %502 = vmatmul.msk.f32.gmra.mxu2 %vm230_vm0, %v227_v4  ;;  %500 = vmatmul.msk.f32.gmra.mxu0 %vm230_vm0, %v225_v5  ;;  %p700_p8 = pneg %p699_p4 }
  0x42   : > { %p705_p10 = pnand %p704_p9, %p700_p8 }
  0xb5   : > { %v260_v6 = vpop.f32.mrf.mxu0 }
  0xb6   : > { %273 = vst.msk [vmem:[#allocation2] sm:$0xff] %vm272_vm1, %v260_v6 }
  0xbb   : > { %v266_v7 = vpop.f32.mrf.mxu2 }
  0xbc   : > { %275 = vst.msk [vmem:[#allocation2 + $0x10] sm:$0xff] %vm272_vm1, %v266_v7 }
  0xbd   : > { %v263_v8 = vpop.f32.mrf.mxu0  ;;  %v277_v12 = vld [vmem:[#allocation2] sm:$0xff] }
  0xbe   : > { %274 = vst.msk [vmem:[#allocation2 + $0x8] sm:$0xff] %vm272_vm1, %v263_v8 }
  0xbf   : > { %279 = vst.msk [vmem:[#allocation3] sm:$0xff] %vm272_vm1, %v277_v12 }
  0xc3   : > { %v269_v9 = vpop.f32.mrf.mxu2  ;;  %v281_v11 = vld [vmem:[#allocation2 + $0x10] sm:$0xff] }
  0xc4   : > { %276 = vst.msk [vmem:[#allocation2 + $0x18] sm:$0xff] %vm272_vm1, %v269_v9 }
  0xc5   : > { %v278_v13 = vld [vmem:[#allocation2 + $0x8] sm:$0xff] }
  0xc6   : > { %280 = vst.msk [vmem:[#allocation3 + $0x8] sm:$0xff] %vm272_vm1, %v278_v13 }
  0xcb   : > { %v282_v10 = vld [vmem:[#allocation2 + $0x18] sm:$0xff] }
  0xcc   : > { %287 = vrot.lane.b32.xlu0 %v282_v10, %s761_s18 }
  0xd4   : > { %285 = vrot.lane.b32.xlu0 %v281_v11, %s761_s18 }
 0x13e   : > { %v288_v14 = vpop.permute.xlu0 %287 }
 0x13f   : > { %293 = vst.msk [vmem:[#allocation3 + $0x8] sm:$0xff] %vm291_vm2, %v288_v14 }
 0x146   : > { %v286_v15 = vpop.permute.xlu0 %285  ;;  %v299_v16 = vld [vmem:[#allocation3 + $0x8] sm:$0xff] }
 0x147   : > { %292 = vst.msk [vmem:[#allocation3] sm:$0xff] %vm291_vm2, %v286_v15  ;;  %326 = vmatpush.msra.mxu1 %v299_v16  ;;  %516 = vmatpush.msra.mxu3 %v299_v16 }
 0x14e   : > { %v298_v19 = vld [vmem:[#allocation3] sm:$0xff] }
 0x14f   : > { %327 = vmatpush.msra.mxu1 %v298_v19  ;;  %517 = vmatpush.msra.mxu3 %v298_v19 }
 0x150   : > { %503 = vmatmul.msk.f32.vlgmr.msra.gmra.mxu1 %vm230_vm0, %v294_v17  ;;  %505 = vmatmul.msk.f32.vlgmr.msra.gmra.mxu3 %vm230_vm0, %v296_v18 }
 0x158   : > { %504 = vmatmul.msk.f32.gmra.mxu1 %vm230_vm0, %v295_v20  ;;  %506 = vmatmul.msk.f32.gmra.mxu3 %vm230_vm0, %v297_v21 }
 0x1cd   : > { %v329_v22 = vpop.f32.mrf.mxu1 }
 0x1ce   : > { %342 = vst.msk [vmem:[#allocation4] sm:$0xff] %vm341_vm3, %v329_v22 }
 0x1d3   : > { %v335_v23 = vpop.f32.mrf.mxu3 }
 0x1d4   : > { %344 = vst.msk [vmem:[#allocation4 + $0x10] sm:$0xff] %vm341_vm3, %v335_v23 }
 0x1d5   : > { %v346_v24 = vld [vmem:[#allocation4] sm:$0xff]  ;;  %v332_v25 = vpop.f32.mrf.mxu1 }
 0x1d6   : > { %343 = vst.msk [vmem:[#allocation4 + $0x8] sm:$0xff] %vm341_vm3, %v332_v25  ;;  %362 = vrot.lane.b32.xlu1 %v346_v24, %s762_s27 }
 0x1d7   : > { %350 = vst.msk [vmem:[%s221_s28] sm:$0xff] %vm272_vm1, %v346_v24 }
 0x1db   : > { %v348_v26 = vld [vmem:[#allocation4 + $0x10] sm:$0xff]  ;;  %v338_v27 = vpop.f32.mrf.mxu3 }
 0x1dc   : > { %345 = vst.msk [vmem:[#allocation4 + $0x18] sm:$0xff] %vm341_vm3, %v338_v27  ;;  %366 = vrot.lane.b32.xlu2 %v348_v26, %s762_s27 }
 0x1dd   : > { %v347_v28 = vld [vmem:[#allocation4 + $0x8] sm:$0xff]  ;;  %352 = vst.msk [vmem:[%s221_s28 + $0x10] sm:$0xff] %vm272_vm1, %v348_v26 }
 0x1de   : > { %364 = vrot.lane.b32.xlu1 %v347_v28, %s762_s27  ;;  %351 = vst.msk [vmem:[%s221_s28 + $0x8] sm:$0xff] %vm272_vm1, %v347_v28 }
 0x1e3   : > { %v349_v29 = vld [vmem:[#allocation4 + $0x18] sm:$0xff] }
 0x1e4   : > { %368 = vrot.lane.b32.xlu2 %v349_v29, %s762_s27  ;;  %353 = vst.msk [vmem:[%s221_s28 + $0x18] sm:$0xff] %vm272_vm1, %v349_v29 }
 0x236   : > { %v367_v30 = vpop.permute.xlu2 %366 }
 0x237   : > { %376 = vst.msk [vmem:[%s221_s28 + $0x30] sm:$0xff] %vm272_vm1, %v367_v30 }
 0x23e   : > { %v369_v31 = vpop.permute.xlu2 %368 }
 0x23f   : > { %377 = vst.msk [vmem:[%s221_s28 + $0x38] sm:$0xff] %vm272_vm1, %v369_v31 }
 0x248   : > { %v363_v32 = vpop.permute.xlu1 %362 }
 0x249   : > { %374 = vst.msk [vmem:[%s221_s28 + $0x20] sm:$0xff] %vm272_vm1, %v363_v32 }
 0x250   : > { %v365_v33 = vpop.permute.xlu1 %364 }
 0x251   : > { %375 = vst.msk [vmem:[%s221_s28 + $0x28] sm:$0xff] %vm272_vm1, %v365_v33 }
 0x252   : > { %708 = shalt.err (!%p705_p10)
}
 0x253   : > { %s763_s29 = smov 128   ;;  %s764_s18 = smov 8  }
 0x254   : > { %528 = dma.vmem_to_hbm [thread:$0]  (%p856_p0), %s392_s17, 1024, %s394_s21, %s379_s20, %s763_s29, %s763_s29, %s764_s18  }
 0x255 PF: > { %p550_p11 = scmp.ge.s32.totalorder %s755_s15, 2  ;;  %s408_s26 = sand.u32 1, %s743_s12  }
 0x256   : > { %s409_s27 = scalar_lea.sflag [#allocation7], %s408_s26 }
 0x257   : > { %p542_p12 = pnand %p550_p11, %p820_p6 }
 0x259   : > { %p543_p13 = pneg %p542_p12 }
 0x25b   : > { %738 = dma.done.wait (%p543_p13), %s409_s27, 1024  }
 0x25c   : > { %740 = vsyncadd (%p543_p13), %s409_s27, 4294966272  ;;  %p15_p3 = scmp.ge.s32.totalorder %s846_s6, 6   ;;  %s970_s12 = smov %s747_s13 }
 0x25d   : > { %s971_s13 = smov %s751_s14  ;;  %s972_s14 = smov %s861_s10 }
 0x25e   : > { %s973_s15 = smov %s846_s6  ;;  %17 = sbr.rel (!%p15_p3) target bundleno = 5 (0x5), region = 84 }
 0x263   :  { %415 = vsyncpa [#allocation6], 1 }
 0x264   :  { %417 = vsyncpa [#allocation6 + $0x1], 1 }
 0x265   :  { %418 = vsyncpa [#allocation9], 1 }
 0x266   :  { %419 = vsyncpa [#allocation7], 1 }
 0x267   :  { %421 = vsyncpa [#allocation7 + $0x1], 1 }

</bundles_post_ra>
